<compile_context>
chip_gen: v7x
topology: tpu7x:2x2x1
jax: 0.10.0
libtpu: 0.0.40
codegen_flags: <defaults>
</compile_context>

<pallas_src>
import functools
import math

import jax
import jax.numpy as jnp
from jax.experimental import pallas as pl
from jax.experimental.pallas import tpu as pltpu

_EPS = 1e-12  # torch.nn.functional.normalize default


def _l2norm_last_kernel(x_ref, o_ref, *, eps):
    # x_ref / o_ref: (block_rows, D) — normalize each row along the last (lane) axis.
    xf = x_ref[...].astype(jnp.float32)
    ss = jnp.sum(xf * xf, axis=-1, keepdims=True)
    # max(sqrt(ss), eps) == sqrt(max(ss, eps*eps)); rsqrt goes to the EUP.
    inv = jax.lax.rsqrt(jnp.maximum(ss, eps * eps))
    o_ref[...] = (xf * inv).astype(o_ref.dtype)


def _l2norm_mid_kernel(x_ref, o_ref, *, eps):
    # x_ref / o_ref: (block_pre, D, post) — normalize along axis 1 (sublane axis).
    xf = x_ref[...].astype(jnp.float32)
    ss = jnp.sum(xf * xf, axis=1, keepdims=True)
    inv = jax.lax.rsqrt(jnp.maximum(ss, eps * eps))
    o_ref[...] = (xf * inv).astype(o_ref.dtype)


def _pick_block(num_rows: int, row_bytes: int, target_bytes: int = 4 << 20) -> int:
    """Rows per block: whole array if it is small, else ~target_bytes (mult. of 8)."""
    if num_rows * row_bytes <= target_bytes:
        return num_rows
    br = max(1, target_bytes // row_bytes)
    br = max(8, (br // 8) * 8)
    return min(br, num_rows)


def l2norm(x: jax.Array, dim: int = 1, eps: float = _EPS) -> jax.Array:
    """Pallas equivalent of L2Norm.forward: F.normalize(x, p=2, dim=dim)."""
    nd = x.ndim
    dim = dim % nd
    shape = x.shape
    d = shape[dim]
    pre = int(math.prod(shape[:dim]))
    post = int(math.prod(shape[dim + 1:]))
    itemsize = jnp.dtype(x.dtype).itemsize

    cost = pl.CostEstimate(
        flops=3 * x.size,
        transcendentals=pre * post,
        bytes_accessed=2 * x.size * itemsize,
    )
    cparams = pltpu.CompilerParams(dimension_semantics=("parallel",))

    if post == 1:
        # Normalization axis is (effectively) the last axis: lane-dense 2-D tiles.
        rows = pre
        x2 = x.reshape(rows, d)  # metadata-only reshape
        block_r = _pick_block(rows, d * itemsize)
        out = pl.pallas_call(
            functools.partial(_l2norm_last_kernel, eps=eps),
            out_shape=jax.ShapeDtypeStruct((rows, d), x.dtype),
            grid=(pl.cdiv(rows, block_r),),
            in_specs=[pl.BlockSpec((block_r, d), lambda i: (i, 0))],
            out_specs=pl.BlockSpec((block_r, d), lambda i: (i, 0)),
            compiler_params=cparams,
            cost_estimate=cost,
        )(x2)
        return out.reshape(shape)

    # Interior axis (e.g. NCHW with dim=1): keep trailing dims fused on the lane
    # axis (lane-dense when prod(trailing) is a multiple of 128) and reduce over
    # the normalization axis on the sublane axis.
    x3 = x.reshape(pre, d, post)  # metadata-only reshape
    block_p = _pick_block(pre, d * post * itemsize)
    out = pl.pallas_call(
        functools.partial(_l2norm_mid_kernel, eps=eps),
        out_shape=jax.ShapeDtypeStruct((pre, d, post), x.dtype),
        grid=(pl.cdiv(pre, block_p),),
        in_specs=[pl.BlockSpec((block_p, d, post), lambda i: (i, 0, 0))],
        out_specs=pl.BlockSpec((block_p, d, post), lambda i: (i, 0, 0)),
        compiler_params=cparams,
        cost_estimate=cost,
    )(x3)
    return out.reshape(shape)


def _ref_l2norm(x, dim=1, eps=_EPS):
    norm = jnp.sqrt(jnp.sum(jnp.square(x.astype(jnp.float32)), axis=dim, keepdims=True))
    return (x.astype(jnp.float32) / jnp.maximum(norm, eps)).astype(x.dtype)


if __name__ == "__main__":
    key = jax.random.PRNGKey(0)

    # Case 1: NCHW input, normalize over channels (dim=1) — interior-axis path.
    x = jax.random.normal(key, (2, 4, 16, 16), dtype=jnp.float32)
    out = l2norm(x, dim=1)
    jax.block_until_ready(out)
    ref = _ref_l2norm(x, dim=1)
    assert out.shape == x.shape and out.dtype == x.dtype
    assert jnp.allclose(out, ref, atol=1e-6, rtol=1e-6), "NCHW L2Norm mismatch"

    # Case 2: (N, C) descriptor input, normalize over dim=1 (= last axis path).
    x2 = jax.random.normal(jax.random.PRNGKey(1), (8, 32), dtype=jnp.float32)
    out2 = l2norm(x2, dim=1)
    jax.block_until_ready(out2)
    ref2 = _ref_l2norm(x2, dim=1)
    assert out2.shape == x2.shape and out2.dtype == x2.dtype
    assert jnp.allclose(out2, ref2, atol=1e-6, rtol=1e-6), "2D L2Norm mismatch"

    print("KERNEL_OK")
</pallas_src>

<mosaic_0001>
module attributes {stable_mosaic.version = 11 : i64} {
  func.func @_l2norm_mid_kernel(%arg0: i32, %arg1: memref<2x4x256xf32, #tpu.memory_space<vmem>>, %arg2: memref<2x4x256xf32, #tpu.memory_space<vmem>>) attributes {dimension_semantics = [#tpu.dimension_semantics<parallel>], iteration_bounds = array<i64: 1>, scalar_prefetch = 0 : i64, scratch_operands = 0 : i64, tpu.core_type = #tpu.core_type<tc>, window_params = [{transform_indices = @transform_0, window_bounds = array<i64: 2, 4, 256>}, {transform_indices = @transform_1, window_bounds = array<i64: 2, 4, 256>}]} {
    %c0 = arith.constant 0 : index
    %c0_0 = arith.constant 0 : index
    %c0_1 = arith.constant 0 : index
    %0 = vector.load %arg1[%c0, %c0_0, %c0_1] : memref<2x4x256xf32, #tpu.memory_space<vmem>>, vector<2x4x256xf32>
    %1 = arith.mulf %0, %0 : vector<2x4x256xf32>
    %cst = arith.constant dense<0.000000e+00> : vector<2x256xf32>
    %2 = vector.multi_reduction <add>, %1, %cst [1] : vector<2x4x256xf32> to vector<2x256xf32>
    %3 = vector.shape_cast %2 : vector<2x256xf32> to vector<2x1x256xf32>
    %cst_2 = arith.constant 1.000000e-24 : f32
    %4 = vector.broadcast %cst_2 : f32 to vector<2x1x256xf32>
    %5 = arith.maximumf %3, %4 : vector<2x1x256xf32>
    %6 = math.rsqrt %5 : vector<2x1x256xf32>
    %7 = vector.broadcast %6 : vector<2x1x256xf32> to vector<2x4x256xf32>
    %8 = arith.mulf %0, %7 : vector<2x4x256xf32>
    %c0_3 = arith.constant 0 : index
    %c0_4 = arith.constant 0 : index
    %c0_5 = arith.constant 0 : index
    %9 = vector.load %arg2[%c0_3, %c0_4, %c0_5] : memref<2x4x256xf32, #tpu.memory_space<vmem>>, vector<2x4x256xf32>
    tpu.vector_store %arg2[%c0_3, %c0_4, %c0_5], %8 {strides = array<i32>} : memref<2x4x256xf32, #tpu.memory_space<vmem>>, vector<2x4x256xf32>,
    return
  }
  func.func @transform_0(%arg0: i32) -> (i32, i32, i32) {
    %c0_i32 = arith.constant 0 : i32
    %c0_i32_0 = arith.constant 0 : i32
    %c0_i32_1 = arith.constant 0 : i32
    return %arg0, %c0_i32, %c0_i32_0 : i32, i32, i32
  }
  func.func @transform_1(%arg0: i32) -> (i32, i32, i32) {
    %c0_i32 = arith.constant 0 : i32
    %c0_i32_0 = arith.constant 0 : i32
    %c0_i32_1 = arith.constant 0 : i32
    return %arg0, %c0_i32, %c0_i32_0 : i32, i32, i32
  }
}

</mosaic_0001>

<bundles_post_ra>
// kernel: tpu_custom_call.1
= control target key start
LH: loop header
LB: loop body
LE: loop exit
PB: predicated region body
PF: predicated region fallthrough
CT: control target
= control target key end

     0   :  { %6 = vsyncpa [#allocation3], 0  ;;  %s203_s0 = inlined_call_operand.hbm [shape: f32[2,4,256], index: 0, kind: input, shape index: {}]   ;;  %s204_s1 = inlined_call_operand.hbm [shape: f32[2,4,256], index: 1, kind: output, shape index: {}]  }
   0x1   :  { %7 = vsyncpa [#allocation4], 0  ;;  %s159_s6 = smov [#allocation2]   ;;  %s111_s10 = scalar_lea.hbm %s203_s0, 256 }
   0x2   :  { %s13_s7 = sshll.u32 %s159_s6, 4  ;;  %p112_p0 = scmp.ne.s32.totalorder %s203_s0, %s111_s10  ;;  %s14_s7 = int_to_ptr.vmem [resolvable:$true] %s13_s7 }
   0x3   :  { %p115_p1 = scmp.lt.u32.totalorder %s111_s10, %s203_s0 }
   0x5   :  { %p117_p2 = pnand %p115_p1, %p112_p0 }
   0x7   :  { %120 = shalt.err (!%p117_p2)
}
   0x8   :  { %s121_s15 = scalar_lea.vmem %s14_s7, 256  ;;  %p126_p4 = scmp.lt.s32.totalorder %s14_s7, %s14_s7 }
   0x9   :  { %p122_p3 = scmp.ne.s32.totalorder %s14_s7, %s121_s15  ;;  %p127_p5 = scmp.lt.s32.totalorder %s121_s15, %s121_s15 }
   0xb   :  { %p128_p6 = por %p127_p5, %p126_p4 }
   0xd   :  { %p129_p7 = pnand %p128_p6, %p122_p3 }
   0xf   :  { %132 = shalt.err (!%p129_p7)
}
  0x10   :  { %s160_s16 = smov 128   ;;  %s161_s17 = smov 8  }
  0x11   :  { %19 = dma.hbm_to_vmem [thread:$0]  %s203_s0, 256, %s14_s7, [#allocation3], %s160_s16, %s160_s16, %s161_s17  }
  0x12   :  { %155 = dma.done.wait [#allocation3], 256  }
  0x13   :  { %156 = vsyncadd [#allocation3], 4294967040  ;;  %v23_v0 = vld [vmem:[#allocation2] sm:$0xff]  ;;  %vm33_vm0 = vcmask 1043456   ;;  %v24_v1 = vld [vmem:[#allocation2 + $0x8] sm:$0xff]  ;;  %s162_s0 = smov [#allocation5]  }
  0x14   :  { %v25_v2 = vmul.f32 %v23_v0, %v23_v0  ;;  %v26_v3 = vmul.f32 %v24_v1, %v24_v1  ;;  %s87_s20 = sshll.u32 %s162_s0, 4  ;;  %s88_s20 = int_to_ptr.vmem [resolvable:$true] %s87_s20 }
  0x15   :  { %s133_s21 = scalar_lea.vmem %s88_s20, 256  ;;  %p138_p9 = scmp.lt.s32.totalorder %s88_s20, %s88_s20 }
  0x16   :  { %v29_v4 = vcombine.high %v25_v2, %v25_v2  ;;  %v34_v5 = vsel %vm33_vm0, %v25_v2, 0.0  ;;  %v30_v6 = vcombine.high %v26_v3, %v26_v3  ;;  %v48_v7 = vsel %vm33_vm0, %v26_v3, 0.0  ;;  %p134_p8 = scmp.ne.s32.totalorder %s88_s20, %s133_s21  ;;  %p139_p10 = scmp.lt.s32.totalorder %s133_s21, %s133_s21 }
  0x17   :  { %v35_v8 = vrot.slane %v34_v5, 4  ;;  %v49_v9 = vrot.slane %v48_v7, 4 }
  0x18   :  { %v41_v10 = vsel %vm33_vm0, %v29_v4, 0.0  ;;  %v55_v11 = vsel %vm33_vm0, %v30_v6, 0.0  ;;  %p140_p11 = por %p139_p10, %p138_p9 }
  0x19   :  { %v36_v12 = vadd.f32 %v35_v8, %v34_v5  ;;  %v42_v13 = vrot.slane %v41_v10, 4  ;;  %v50_v14 = vadd.f32 %v49_v9, %v48_v7  ;;  %v56_v15 = vrot.slane %v55_v11, 4 }
  0x1a   :  { %p141_p12 = pnand %p140_p11, %p134_p8 }
  0x1b   :  { %v37_v16 = vrot.slane %v36_v12, 2  ;;  %v43_v17 = vadd.f32 %v42_v13, %v41_v10  ;;  %v51_v18 = vrot.slane %v50_v14, 2  ;;  %v57_v19 = vadd.f32 %v56_v15, %v55_v11 }
  0x1d   :  { %v38_v20 = vadd.f32 %v37_v16, %v36_v12  ;;  %v44_v21 = vrot.slane %v43_v17, 2  ;;  %v52_v22 = vadd.f32 %v51_v18, %v50_v14  ;;  %v58_v23 = vrot.slane %v57_v19, 2 }
  0x1f   :  { %v39_v24 = vrot.slane %v38_v20, 1  ;;  %v45_v25 = vadd.f32 %v44_v21, %v43_v17  ;;  %v53_v26 = vrot.slane %v52_v22, 1  ;;  %v59_v27 = vadd.f32 %v58_v23, %v57_v19 }
  0x21   :  { %v40_v28 = vadd.f32 %v39_v24, %v38_v20  ;;  %v46_v29 = vrot.slane %v45_v25, 1  ;;  %v54_v30 = vadd.f32 %v53_v26, %v52_v22  ;;  %v60_v31 = vrot.slane %v59_v27, 1 }
  0x23   :  { %v47_v32 = vadd.f32 %v46_v29, %v45_v25  ;;  %v62_v33 = vmax.f32 %v40_v28, 1e-24  ;;  %v61_v34 = vadd.f32 %v60_v31, %v59_v27  ;;  %v64_v35 = vmax.f32 %v54_v30, 1e-24 }
  0x25   :  { %v63_v36 = vmax.f32 %v47_v32, 1e-24  ;;  %103 = vrsqrt.f32 %v62_v33  ;;  %v65_v37 = vmax.f32 %v61_v34, 1e-24 }
  0x26   :  { %105 = vrsqrt.f32 %v64_v35 }
  0x27   :  { %107 = vrsqrt.f32 %v63_v36 }
  0x28   :  { %109 = vrsqrt.f32 %v65_v37 }
  0x2f   :  { %v104_v38 = vpop.eup %103 }
  0x30   :  { %v106_v39 = vpop.eup %105 }
  0x31   :  { %v108_v40 = vpop.eup %107 }
  0x32   :  { %v110_v41 = vpop.eup %109  ;;  %v74_v42 = vcombine.low %v104_v38, %v108_v40 }
  0x33   :  { %v75_v43 = vcombine.low %v106_v39, %v110_v41 }
  0x34   :  { %v78_v44 = vmul.f32 %v74_v42, %v23_v0 }
  0x35   :  { %v79_v45 = vmul.f32 %v75_v43, %v24_v1 }
  0x36   :  { %80 = vst [vmem:[#allocation5] sm:$0xff] %v78_v44 }
  0x37   :  { %81 = vst [vmem:[#allocation5 + $0x8] sm:$0xff] %v79_v45 }
  0x38   :  { %144 = shalt.err (!%p141_p12)
}
  0x39   :  { %s145_s24 = scalar_lea.hbm %s204_s1, 256 }
  0x3a   :  { %p146_p13 = scmp.ne.s32.totalorder %s204_s1, %s145_s24  ;;  %p149_p0 = scmp.lt.u32.totalorder %s145_s24, %s204_s1 }
  0x3c   :  { %p151_p1 = pnand %p149_p0, %p146_p13 }
  0x3e   :  { %154 = shalt.err (!%p151_p1)
}
  0x3f   :  { %93 = dma.vmem_to_hbm [thread:$0]  %s88_s20, 256, %s204_s1, [#allocation4], %s160_s16, %s160_s16, %s161_s17  }
  0x40   :  { %157 = dma.done.wait [#allocation4], 256  }
  0x41   :  { %158 = vsyncadd [#allocation4], 4294967040 }
  0x42   :  { %97 = vsyncpa [#allocation3], 1 }
  0x43   :  { %98 = vsyncpa [#allocation4], 1 }

</bundles_post_ra>
